<compile_context>
chip_gen: v5e
topology: v5e:2x2
jax: 0.10.0
libtpu: 0.0.40
codegen_flags: <defaults>
</compile_context>

<pallas_src>
import math
import functools

import jax
import jax.numpy as jnp
from jax import lax
from jax.experimental import pallas as pl
from jax.experimental.pallas import tpu as pltpu


def _build_pe(len_embedding: int, max_len: int) -> jnp.ndarray:
    """Deterministic sinusoidal positional-encoding table, shape (1, max_len, E)."""
    position = jnp.arange(0, max_len, dtype=jnp.float32)[:, None]           # (max_len, 1)
    idx_odd = jnp.arange(0, len_embedding, 2, dtype=jnp.float32)
    if len_embedding % 2 == 0:
        idx_even = idx_odd
    else:
        idx_even = jnp.arange(0, len_embedding - 1, 2, dtype=jnp.float32)
    scale = -(math.log(10000.0) / len_embedding)
    div_term_odd = jnp.exp(idx_odd * scale)
    div_term_even = jnp.exp(idx_even * scale)

    pe = jnp.zeros((max_len, len_embedding), dtype=jnp.float32)
    pe = pe.at[:, 0::2].set(jnp.sin(position * div_term_odd))
    pe = pe.at[:, 1::2].set(jnp.cos(position * div_term_even))
    return pe[None, :, :]                                                    # (1, max_len, E)


def _pick_tiles(n_rows: int, n_cols: int, elem_bytes: int = 4,
                target_block_bytes: int = 2 * 1024 * 1024):
    """Pick a lane-dense (rows, cols) block of roughly `target_block_bytes`.

    Each of the last two block dims is either a multiple of (8, 128) or equal to
    the full array dim, and divides the array dim exactly (no ragged blocks).
    ~2 MiB blocks keep the double-buffered working set well inside the default
    scoped-VMEM budget on v5e/v6e/v7x while amortizing the per-step overhead.
    """
    # Lane (last) dim.
    if n_cols % 128 == 0:
        budget_cols = max(128, (target_block_bytes // elem_bytes // 128) * 128)
        tc = min(n_cols, budget_cols)
        while n_cols % tc != 0:
            tc -= 128
    else:
        tc = n_cols                      # full rows are always a legal block shape
    # Sublane (second-to-last) dim.
    rows_budget = max(1, target_block_bytes // (tc * elem_bytes))
    if rows_budget >= n_rows:
        tr = n_rows
    else:
        tr = (rows_budget // 8) * 8
        while tr >= 8 and n_rows % tr != 0:
            tr -= 8
        if tr < 8:
            tr = n_rows                  # fallback: single block over all rows
    return tr, tc


def _lrs32(v, k: int):
    """Logical right shift for int32: arithmetic shift then mask off sign bits."""
    return (v >> k) & jnp.int32((1 << (32 - k)) - 1)


def _pos_enc_kernel(seed_ref, x_ref, pe_ref, o_ref, *, rate_dropout: float,
                    training: bool, n_cols: int):
    # x_ref : (tR, tC) tile of the flattened (B, S*E) embeddings
    # pe_ref: (1, tC) tile of the flattened positional-encoding row; the add
    #         broadcasts it across the sublane (batch-row) axis on the VPU.
    emb = x_ref[...] + pe_ref[...]

    if training and rate_dropout >= 1.0:
        # Degenerate p == 1: everything is dropped (avoids threshold overflow).
        o_ref[...] = jnp.zeros_like(emb)
        return

    if training and rate_dropout > 0.0:
        # Inverted dropout with a counter-based hash: deterministic, independent
        # of tiling/grid order, no TPU-only PRNG primitives needed.
        tr, tc = emb.shape
        rows = lax.broadcasted_iota(jnp.int32, (tr, tc), 0)
        cols = lax.broadcasted_iota(jnp.int32, (tr, tc), 1)
        g_row = pl.program_id(1) * tr + rows            # batch-row axis (inner grid)
        g_col = pl.program_id(0) * tc + cols            # column-tile axis (outer grid)
        v = seed_ref[0] + g_row * jnp.int32(n_cols) + g_col   # global flat index + seed
        # murmur3 finalizer (int32 wrap-around arithmetic).
        v = v ^ _lrs32(v, 16)
        v = v * jnp.int32(-2048144789)                  # 0x85ebca6b
        v = v ^ _lrs32(v, 13)
        v = v * jnp.int32(-1028477387)                  # 0xc2b2ae35
        v = v ^ _lrs32(v, 16)
        u = v & jnp.int32(0x7FFFFFFF)                   # uniform non-negative 31-bit
        threshold = jnp.int32(min(int(rate_dropout * 2147483648.0), 2147483647))
        scale = jnp.float32(1.0 / (1.0 - rate_dropout))
        # Single select + one multiply (no int->float cast, no second vmul).
        emb = jnp.where(u >= threshold, emb * scale, jnp.float32(0.0))

    o_ref[...] = emb


def positional_encoding_forward(word_embedding: jnp.ndarray,
                                pe: jnp.ndarray,
                                *,
                                rate_dropout: float = 0.1,
                                training: bool = False,
                                seed: int = 0) -> jnp.ndarray:
    """word_embedding: (B, S, E) float32; pe: (1, max_len, E) float32."""
    B, S, E = word_embedding.shape
    N = S * E

    # Lane-dense 2-D layout: last dim becomes S*E (a multiple of 128 for typical
    # embedding sizes) so stores are wide and unmasked instead of sub-128-lane
    # masked partial stores.
    x2 = word_embedding.reshape(B, N)
    pe2 = pe[:, :S, :].reshape(1, N).astype(word_embedding.dtype)   # tiny table, static slice

    itemsize = word_embedding.dtype.itemsize
    tR, tC = _pick_tiles(B, N, elem_bytes=itemsize)
    # Batch-row axis innermost: the pe block index depends only on the outer
    # (column-tile) axis, so its DMA is skipped across consecutive inner steps.
    grid = (N // tC, B // tR)

    seed_arr = jnp.asarray([seed], dtype=jnp.int32)

    kernel = functools.partial(_pos_enc_kernel,
                               rate_dropout=float(rate_dropout),
                               training=bool(training),
                               n_cols=N)

    cost = pl.CostEstimate(
        flops=B * N,                                     # one add per element
        transcendentals=0,
        bytes_accessed=(2 * B * N + N) * itemsize)       # read x, write out, read pe

    out2 = pl.pallas_call(
        kernel,
        out_shape=jax.ShapeDtypeStruct((B, N), word_embedding.dtype),
        grid=grid,
        in_specs=[
            pl.BlockSpec(memory_space=pltpu.SMEM),            # seed scalar
            pl.BlockSpec((tR, tC), lambda c, b: (b, c)),      # x tile
            pl.BlockSpec((1, tC), lambda c, b: (0, c)),       # shared pe tile
        ],
        out_specs=pl.BlockSpec((tR, tC), lambda c, b: (b, c)),
        compiler_params=pltpu.CompilerParams(
            dimension_semantics=("parallel", "parallel"),
            vmem_limit_bytes=32 * 1024 * 1024),
        cost_estimate=cost,
    )(seed_arr, x2, pe2)

    return out2.reshape(B, S, E)


if __name__ == "__main__":
    # Small shapes consistent with the module: batch=2, seq=8, embed=32.
    B, S, E = 2, 8, 32
    max_len = 64                       # >= S (module default is 5000; kept small here)
    rate_dropout = 0.1

    key = jax.random.PRNGKey(0)
    word_embedding = jax.random.normal(key, (B, S, E), dtype=jnp.float32)
    pe = _build_pe(E, max_len)

    # Eval mode: dropout is identity -> must match the pure-JAX reference.
    out_eval = positional_encoding_forward(word_embedding, pe,
                                           rate_dropout=rate_dropout,
                                           training=False)
    out_eval = jax.block_until_ready(out_eval)
    ref = word_embedding + pe[:, :S, :]
    assert out_eval.shape == (B, S, E)
    assert jnp.allclose(out_eval, ref, atol=1e-6), "eval-mode mismatch"

    # Train mode: inverted dropout.  Every output element must be either 0
    # (dropped) or ref / keep_prob (kept), and the drop count must be sane.
    out_train = positional_encoding_forward(word_embedding, pe,
                                            rate_dropout=rate_dropout,
                                            training=True, seed=1234)
    out_train = jax.block_until_ready(out_train)
    assert out_train.shape == (B, S, E)
    keep_scaled = ref / (1.0 - rate_dropout)
    ok = jnp.all((out_train == 0.0) | (jnp.abs(out_train - keep_scaled) < 1e-5))
    assert bool(ok), "train-mode dropout values mismatch"
    n_drop = int(jnp.sum(out_train == 0.0))
    assert 0 < n_drop < out_train.size // 2, "dropout rate implausible"

    print("KERNEL_OK")
</pallas_src>

<mosaic_0001>
module attributes {stable_mosaic.version = 11 : i64} {
  func.func @_pos_enc_kernel(%arg0: i32, %arg1: i32, %arg2: memref<1xi32, #tpu.memory_space<smem>>, %arg3: memref<2x256xf32, #tpu.memory_space<vmem>>, %arg4: memref<1x256xf32, #tpu.memory_space<vmem>>, %arg5: memref<2x256xf32, #tpu.memory_space<vmem>>) attributes {dimension_semantics = [#tpu.dimension_semantics<parallel>, #tpu.dimension_semantics<parallel>], iteration_bounds = array<i64: 1, 1>, scalar_prefetch = 0 : i64, scratch_operands = 0 : i64, tpu.core_type = #tpu.core_type<tc>, window_params = [{transform_indices = @transform_0, window_bounds = array<i64: 1>}, {transform_indices = @transform_1, window_bounds = array<i64: 2, 256>}, {transform_indices = @transform_2, window_bounds = array<i64: 1, 256>}, {transform_indices = @transform_3, window_bounds = array<i64: 2, 256>}]} {
    %c0 = arith.constant 0 : index
    %c0_0 = arith.constant 0 : index
    %0 = vector.load %arg3[%c0, %c0_0] : memref<2x256xf32, #tpu.memory_space<vmem>>, vector<2x256xf32>
    %c0_1 = arith.constant 0 : index
    %c0_2 = arith.constant 0 : index
    %1 = vector.load %arg4[%c0_1, %c0_2] : memref<1x256xf32, #tpu.memory_space<vmem>>, vector<1x256xf32>
    %2 = vector.broadcast %1 : vector<1x256xf32> to vector<2x256xf32>
    %3 = arith.addf %0, %2 : vector<2x256xf32>
    %c0_3 = arith.constant 0 : index
    %c0_4 = arith.constant 0 : index
    %4 = vector.load %arg5[%c0_3, %c0_4] : memref<2x256xf32, #tpu.memory_space<vmem>>, vector<2x256xf32>
    tpu.vector_store %arg5[%c0_3, %c0_4], %3 {strides = array<i32>} : memref<2x256xf32, #tpu.memory_space<vmem>>, vector<2x256xf32>,
    return
  }
  func.func @transform_0(%arg0: i32, %arg1: i32) -> i32 {
    %c0_i32 = arith.constant 0 : i32
    %c0_i32_0 = arith.constant 0 : i32
    return %c0_i32 : i32
  }
  func.func @transform_1(%arg0: i32, %arg1: i32) -> (i32, i32) {
    %c0_i32 = arith.constant 0 : i32
    return %arg1, %arg0 : i32, i32
  }
  func.func @transform_2(%arg0: i32, %arg1: i32) -> (i32, i32) {
    %c0_i32 = arith.constant 0 : i32
    %c0_i32_0 = arith.constant 0 : i32
    return %c0_i32, %arg0 : i32, i32
  }
  func.func @transform_3(%arg0: i32, %arg1: i32) -> (i32, i32) {
    %c0_i32 = arith.constant 0 : i32
    return %arg1, %arg0 : i32, i32
  }
}

</mosaic_0001>

<bundles_post_ra>
// kernel: tpu_custom_call.1
= control target key start
LH: loop header
LB: loop body
LE: loop exit
PB: predicated region body
PF: predicated region fallthrough
CT: control target
= control target key end

     0   :  { %9 = vsyncpa [#allocation4], 0  ;;  %s143_s0 = inlined_call_operand.<no memory space> [shape: s32[1], index: 0, kind: input, shape index: {}]   ;;  %s144_s1 = inlined_call_operand.hbm [shape: f32[2,256], index: 1, kind: input, shape index: {}]   ;;  %s145_s2 = inlined_call_operand.vmem [shape: f32[1,256], index: 2, kind: input, shape index: {}]   ;;  %s146_s3 = inlined_call_operand.hbm [shape: f32[2,256], index: 3, kind: output, shape index: {}]  }
   0x1   :  { %10 = vsyncpa [#allocation5], 0  ;;  %s18_s14 = sshll.u32 %s144_s1, 4  ;;  %s112_s15 = smov [#allocation3]   ;;  %s19_s14 = int_to_ptr.hbm [resolvable:$true] %s18_s14 }
   0x2   :  { %s20_s16 = sshll.u32 %s112_s15, 4  ;;  %s21_s16 = int_to_ptr.vmem [resolvable:$true] %s20_s16 }
   0x3   :  { %23 = dma.hbm_to_vmem [thread:$0]  %s19_s14, 64, %s21_s16, [#allocation4]  }
   0x4   :  { %108 = dma.done.wait [#allocation4], 64  }
   0x5   :  { %109 = vsyncadd [#allocation4], 4294967232  ;;  %v31_v0 = vld [vmem:[%s145_s2] sm:$0x3]  ;;  %vm36_vm0 = vcmask 1041408   ;;  %s113_s18 = smov [#allocation6]  }
   0x6   :  { %v33_v1 = vperm.slane %v31_v0, 0  ;;  %v34_v2 = vperm.slane %v31_v0, 1  ;;  %v30_v3 = vld [vmem:[#allocation3] sm:$0xf]  ;;  %s46_s19 = sshll.u32 %s113_s18, 4  ;;  %s48_s21 = sshll.u32 %s146_s3, 4  ;;  %s47_s19 = int_to_ptr.vmem [resolvable:$true] %s46_s19  ;;  %s49_s21 = int_to_ptr.hbm [resolvable:$true] %s48_s21 }
   0x8   :  { %v35_v4 = vrot.slane %v34_v2, 6 }
   0xa   :  { %v37_v5 = vsel %vm36_vm0, %v33_v1, %v35_v4 }
   0xb   :  { %v39_v6 = vadd.f32 %v37_v5, %v30_v3 }
   0xd   :  { %40 = vst [vmem:[#allocation6] sm:$0xf] %v39_v6 }
   0xe   :  { %51 = dma.vmem_to_hbm [thread:$0]  %s47_s19, 64, %s49_s21, [#allocation5]  }
   0xf   :  { %110 = dma.done.wait [#allocation5], 64  }
  0x10   :  { %111 = vsyncadd [#allocation5], 4294967232 }
  0x11   :  { %56 = vsyncpa [#allocation4], 1 }
  0x12   :  { %57 = vsyncpa [#allocation5], 1 }

</bundles_post_ra>
